<compile_context>
chip_gen: v6e
topology: v6e:2x2x1
jax: 0.10.0
libtpu: 0.0.40
codegen_flags: <defaults>
</compile_context>

<pallas_src>
import functools
import math

import jax
import jax.numpy as jnp
from jax.experimental import pallas as pl
from jax.experimental.pallas import tpu as pltpu


def _layernorm(z, gamma, beta, eps=1e-5):
    mu = jnp.mean(z, axis=-1, keepdims=True)
    var = jnp.mean((z - mu) ** 2, axis=-1, keepdims=True)
    return (z - mu) * jax.lax.rsqrt(var + eps) * gamma + beta


def decoder_kernel(
    x_ref, bias_ref, wqkv_ref, wo_ref, w1_ref, w2_ref, vec_ref, o_ref,
    *, num_heads, activation, norm_placing,
):
    R, E = x_ref.shape                       # R = B * S rows
    Dh = E // num_heads
    F = w1_ref.shape[1]

    x = x_ref[...]                           # (R, E)

    # Packed small vectors: one (8, 128) tile, static lane slices.
    bqkv = vec_ref[0:1, : 3 * E]             # (1, 3E) (Q-part already scaled)
    bo = vec_ref[1:2, :E]
    b1 = vec_ref[2:3, :F]
    b2 = vec_ref[3:4, :E]
    g0 = vec_ref[4:5, :E]
    be0 = vec_ref[5:6, :E]
    g1 = vec_ref[6:7, :E]
    be1 = vec_ref[7:8, :E]

    # Precomputed block-diagonal additive mask bias (wrapper-built, (R, R)).
    bias = bias_ref[...]

    def mha(inp):                            # inp: (R, E)
        # One fused, pre-scaled QKV projection: (R, E) @ (E, 3E).
        qkv = jnp.dot(inp, wqkv_ref[...],
                      preferred_element_type=jnp.float32) + bqkv     # (R, 3E)
        head_outs = []
        for h in range(num_heads):           # static tiny loop
            qh = qkv[:, h * Dh:(h + 1) * Dh]
            kh = qkv[:, E + h * Dh:E + (h + 1) * Dh]
            vh = qkv[:, 2 * E + h * Dh:2 * E + (h + 1) * Dh]
            scores = jax.lax.dot_general(
                qh, kh, (((1,), (1,)), ((), ())),
                preferred_element_type=jnp.float32) + bias           # (R, R)
            m = jnp.max(scores, axis=-1, keepdims=True)
            e = jnp.exp(scores - m)
            w = e / jnp.sum(e, axis=-1, keepdims=True)               # exact
            head_outs.append(
                jnp.dot(w, vh, preferred_element_type=jnp.float32))  # (R, Dh)
        z_cat = jnp.concatenate(head_outs, axis=-1)                  # (R, E)
        # Single full-width output projection.
        return jnp.dot(z_cat, wo_ref[...],
                       preferred_element_type=jnp.float32) + bo

    def ffn(inp):
        h = jnp.dot(inp, w1_ref[...], preferred_element_type=jnp.float32) + b1
        if activation == "relu":
            h = jnp.maximum(h, 0.0)
        else:
            # exact GELU (matches torch.nn.functional.gelu default)
            h = 0.5 * h * (1.0 + jax.lax.erf(h * (1.0 / math.sqrt(2.0))))
        return jnp.dot(h, w2_ref[...], preferred_element_type=jnp.float32) + b2

    if norm_placing == "post":
        z = _layernorm(x + mha(x), g0, be0)
        z = _layernorm(z + ffn(z), g1, be1)
    else:  # pre-norm
        zn = _layernorm(x, g0, be0)
        xr = x + mha(zn)
        z = xr + ffn(_layernorm(xr, g1, be1))

    o_ref[...] = z


def decoder_forward(x, dec_mask, kernel_params, *, num_heads,
                    activation="relu", norm_placing="post"):
    B, S, E = x.shape
    wqkv, wo, w1, w2, vecs = kernel_params
    R = B * S

    # Flatten batch into rows (free, row-major contiguous).
    x2 = x.reshape(R, E)

    # Additive mask bias, built once in the wrapper:
    #   diagonal (per-batch) blocks  : where(mask==0, -1e30, 0)
    #   off-diagonal (cross-batch)   : -1e30  -> underflows to 0 after softmax
    neg = jnp.where(dec_mask == 0, jnp.float32(-1e30), jnp.float32(0.0))  # (S,S)
    eye_b = jnp.eye(B, dtype=jnp.float32)
    bias = (jnp.kron(eye_b, neg)
            + jnp.kron(1.0 - eye_b, jnp.full((S, S), -1e30, jnp.float32)))  # (R,R)

    kernel = functools.partial(
        decoder_kernel, num_heads=num_heads,
        activation=activation, norm_placing=norm_placing)

    def full(a):
        nd = a.ndim
        return pl.BlockSpec(a.shape, lambda i, _nd=nd: (0,) * _nd)

    out2d = pl.pallas_call(
        kernel,
        out_shape=jax.ShapeDtypeStruct((R, E), jnp.float32),
        grid=(1,),
        in_specs=[pl.BlockSpec((R, E), lambda i: (0, 0)),
                  full(bias), full(wqkv), full(wo),
                  full(w1), full(w2), full(vecs)],
        out_specs=pl.BlockSpec((R, E), lambda i: (0, 0)),
        compiler_params=pltpu.CompilerParams(
            dimension_semantics=("arbitrary",)),
    )(x2, bias, wqkv, wo, w1, w2, vecs)

    return out2d.reshape(B, S, E)


# ----------------------- pure-JAX reference (PyTorch semantics) --------------
def decoder_ref(x, mask, W, *, num_heads, activation, norm_placing):
    wq, bq, wk, bk, wv, bv, wo, bo, w1, b1, w2, b2, g0, be0, g1, be1 = W
    B, S, E = x.shape
    Dh = E // num_heads

    def ln(z, g, b):
        mu = z.mean(-1, keepdims=True)
        var = ((z - mu) ** 2).mean(-1, keepdims=True)
        return (z - mu) / jnp.sqrt(var + 1e-5) * g + b

    def mha(inp):
        q = (inp @ wq + bq).reshape(B, S, num_heads, Dh).transpose(0, 2, 1, 3)
        k = (inp @ wk + bk).reshape(B, S, num_heads, Dh).transpose(0, 2, 1, 3)
        v = (inp @ wv + bv).reshape(B, S, num_heads, Dh).transpose(0, 2, 1, 3)
        s = q @ jnp.swapaxes(k, -1, -2) / math.sqrt(Dh)
        s = jnp.where(mask == 0, -jnp.inf, s)
        w = jax.nn.softmax(s, axis=-1)
        z = (w @ v).transpose(0, 2, 1, 3).reshape(B, S, E)
        return z @ wo + bo

    def ffn(inp):
        h = inp @ w1 + b1
        if activation == "relu":
            h = jnp.maximum(h, 0.0)
        else:
            h = 0.5 * h * (1.0 + jax.lax.erf(h / jnp.sqrt(2.0)))
        return h @ w2 + b2

    if norm_placing == "post":
        z = ln(x + mha(x), g0, be0)
        z = ln(z + ffn(z), g1, be1)
    else:
        z0 = ln(x, g0, be0)
        xr = x + mha(z0)
        z = xr + ffn(ln(xr, g1, be1))
    return z


if __name__ == "__main__":
    # ModelParams: embed_dim=32, num_heads=4, ff_dim=64, dropout_prob=0.0,
    #              activation_name='relu', norm_placing='post'
    B, S, E, H, F = 2, 8, 32, 4, 64
    Dh = E // H
    activation = "relu"
    norm_placing = "post"

    key = jax.random.PRNGKey(0)
    ks = jax.random.split(key, 16)
    sc_e = 1.0 / math.sqrt(E)
    sc_f = 1.0 / math.sqrt(F)

    # Linear weights stored as (in_features, out_features); y = x @ W + b.
    wq = jax.random.normal(ks[0], (E, E), jnp.float32) * sc_e
    bq = jax.random.normal(ks[1], (E,), jnp.float32) * 0.02
    wk = jax.random.normal(ks[2], (E, E), jnp.float32) * sc_e
    bk = jax.random.normal(ks[3], (E,), jnp.float32) * 0.02
    wv = jax.random.normal(ks[4], (E, E), jnp.float32) * sc_e
    bv = jax.random.normal(ks[5], (E,), jnp.float32) * 0.02
    wo = jax.random.normal(ks[6], (E, E), jnp.float32) * sc_e
    bo = jax.random.normal(ks[7], (E,), jnp.float32) * 0.02
    w1 = jax.random.normal(ks[8], (E, F), jnp.float32) * sc_e
    b1 = jax.random.normal(ks[9], (F,), jnp.float32) * 0.02
    w2 = jax.random.normal(ks[10], (F, E), jnp.float32) * sc_f
    b2 = jax.random.normal(ks[11], (E,), jnp.float32) * 0.02
    g0 = jnp.ones((E,), jnp.float32)
    be0 = jnp.zeros((E,), jnp.float32)
    g1 = jnp.ones((E,), jnp.float32)
    be1 = jnp.zeros((E,), jnp.float32)

    ref_params = (wq, bq, wk, bk, wv, bv, wo, bo, w1, b1, w2, b2, g0, be0, g1, be1)

    # ---------------- kernel-side parameter packing ----------------
    # Fused QKV weight (E, 3E), with 1/sqrt(Dh) folded into the Q columns
    # (and Q bias) so the kernel never multiplies by the scale.
    scale = 1.0 / math.sqrt(Dh)
    wqkv = jnp.concatenate([wq * scale, wk, wv], axis=1)
    # All small vectors packed into one (8, 128) tile.
    pad_w = max(3 * E, F, E, 128)
    vecs = jnp.zeros((8, pad_w), jnp.float32)
    vecs = vecs.at[0, :3 * E].set(jnp.concatenate([bq * scale, bk, bv]))
    vecs = vecs.at[1, :E].set(bo)
    vecs = vecs.at[2, :F].set(b1)
    vecs = vecs.at[3, :E].set(b2)
    vecs = vecs.at[4, :E].set(g0)
    vecs = vecs.at[5, :E].set(be0)
    vecs = vecs.at[6, :E].set(g1)
    vecs = vecs.at[7, :E].set(be1)
    kernel_params = (wqkv, wo, w1, w2, vecs)

    x = jax.random.normal(jax.random.PRNGKey(1), (B, S, E), jnp.float32)
    dec_mask = jnp.tril(jnp.ones((S, S), jnp.float32))   # causal decoder mask

    out = decoder_forward(x, dec_mask, kernel_params, num_heads=H,
                          activation=activation, norm_placing=norm_placing)
    out = jax.block_until_ready(out)

    ref = decoder_ref(x, dec_mask, ref_params, num_heads=H,
                      activation=activation, norm_placing=norm_placing)
    assert out.shape == (B, S, E)
    max_err = float(jnp.max(jnp.abs(out - ref)))
    assert jnp.allclose(out, ref, rtol=2e-3, atol=2e-3), max_err

    print("KERNEL_OK")
</pallas_src>

<mosaic_0001>
module attributes {stable_mosaic.version = 11 : i64} {
  func.func @decoder_kernel(%arg0: i32, %arg1: memref<16x32xf32, #tpu.memory_space<vmem>>, %arg2: memref<16x16xf32, #tpu.memory_space<vmem>>, %arg3: memref<32x96xf32, #tpu.memory_space<vmem>>, %arg4: memref<32x32xf32, #tpu.memory_space<vmem>>, %arg5: memref<32x64xf32, #tpu.memory_space<vmem>>, %arg6: memref<64x32xf32, #tpu.memory_space<vmem>>, %arg7: memref<8x128xf32, #tpu.memory_space<vmem>>, %arg8: memref<16x32xf32, #tpu.memory_space<vmem>>) attributes {dimension_semantics = [#tpu.dimension_semantics<arbitrary>], iteration_bounds = array<i64: 1>, scalar_prefetch = 0 : i64, scratch_operands = 0 : i64, tpu.core_type = #tpu.core_type<tc>, window_params = [{pipeline_mode = #tpu.pipeline_mode<synchronous>, transform_indices = @transform_0, window_bounds = array<i64: 16, 32>}, {pipeline_mode = #tpu.pipeline_mode<synchronous>, transform_indices = @transform_1, window_bounds = array<i64: 16, 16>}, {pipeline_mode = #tpu.pipeline_mode<synchronous>, transform_indices = @transform_2, window_bounds = array<i64: 32, 96>}, {pipeline_mode = #tpu.pipeline_mode<synchronous>, transform_indices = @transform_3, window_bounds = array<i64: 32, 32>}, {pipeline_mode = #tpu.pipeline_mode<synchronous>, transform_indices = @transform_4, window_bounds = array<i64: 32, 64>}, {pipeline_mode = #tpu.pipeline_mode<synchronous>, transform_indices = @transform_5, window_bounds = array<i64: 64, 32>}, {pipeline_mode = #tpu.pipeline_mode<synchronous>, transform_indices = @transform_6, window_bounds = array<i64: 8, 128>}, {pipeline_mode = #tpu.pipeline_mode<synchronous>, transform_indices = @transform_7, window_bounds = array<i64: 16, 32>}]} {
    %c0 = arith.constant 0 : index
    %c0_0 = arith.constant 0 : index
    %0 = vector.load %arg1[%c0, %c0_0] : memref<16x32xf32, #tpu.memory_space<vmem>>, vector<16x32xf32>
    %c0_1 = arith.constant 0 : index
    %c0_2 = arith.constant 0 : index
    %1 = vector.load %arg7[%c0_1, %c0_2] : memref<8x128xf32, #tpu.memory_space<vmem>>, vector<1x96xf32>
    %c1 = arith.constant 1 : index
    %c0_3 = arith.constant 0 : index
    %2 = vector.load %arg7[%c1, %c0_3] : memref<8x128xf32, #tpu.memory_space<vmem>>, vector<1x32xf32>
    %c2 = arith.constant 2 : index
    %c0_4 = arith.constant 0 : index
    %3 = vector.load %arg7[%c2, %c0_4] : memref<8x128xf32, #tpu.memory_space<vmem>>, vector<1x64xf32>
    %c3 = arith.constant 3 : index
    %c0_5 = arith.constant 0 : index
    %4 = vector.load %arg7[%c3, %c0_5] : memref<8x128xf32, #tpu.memory_space<vmem>>, vector<1x32xf32>
    %c4 = arith.constant 4 : index
    %c0_6 = arith.constant 0 : index
    %5 = vector.load %arg7[%c4, %c0_6] : memref<8x128xf32, #tpu.memory_space<vmem>>, vector<1x32xf32>
    %c5 = arith.constant 5 : index
    %c0_7 = arith.constant 0 : index
    %6 = vector.load %arg7[%c5, %c0_7] : memref<8x128xf32, #tpu.memory_space<vmem>>, vector<1x32xf32>
    %c6 = arith.constant 6 : index
    %c0_8 = arith.constant 0 : index
    %7 = vector.load %arg7[%c6, %c0_8] : memref<8x128xf32, #tpu.memory_space<vmem>>, vector<1x32xf32>
    %c7 = arith.constant 7 : index
    %c0_9 = arith.constant 0 : index
    %8 = vector.load %arg7[%c7, %c0_9] : memref<8x128xf32, #tpu.memory_space<vmem>>, vector<1x32xf32>
    %c0_10 = arith.constant 0 : index
    %c0_11 = arith.constant 0 : index
    %9 = vector.load %arg2[%c0_10, %c0_11] : memref<16x16xf32, #tpu.memory_space<vmem>>, vector<16x16xf32>
    %c0_12 = arith.constant 0 : index
    %c0_13 = arith.constant 0 : index
    %10 = vector.load %arg3[%c0_12, %c0_13] : memref<32x96xf32, #tpu.memory_space<vmem>>, vector<32x96xf32>
    %cst = arith.constant dense<0.000000e+00> : vector<16x96xf32>
    %11 = tpu.matmul %0, %10, %cst {dimension_numbers = #tpu.dot_dimension_numbers<[1], [0], [0], [1], [0, 0, 1, 1], [], []>} : vector<16x32xf32>, vector<32x96xf32>, vector<16x96xf32> -> vector<16x96xf32>
    %12 = vector.broadcast %1 : vector<1x96xf32> to vector<16x96xf32>
    %13 = arith.addf %11, %12 : vector<16x96xf32>
    %14 = vector.extract_strided_slice %13 {offsets = [0, 0], sizes = [16, 8], strides = [1, 1]} : vector<16x96xf32> to vector<16x8xf32>
    %15 = vector.extract_strided_slice %13 {offsets = [0, 32], sizes = [16, 8], strides = [1, 1]} : vector<16x96xf32> to vector<16x8xf32>
    %16 = vector.extract_strided_slice %13 {offsets = [0, 64], sizes = [16, 8], strides = [1, 1]} : vector<16x96xf32> to vector<16x8xf32>
    %cst_14 = arith.constant dense<0.000000e+00> : vector<16x16xf32>
    %17 = tpu.matmul %14, %15, %cst_14 {dimension_numbers = #tpu.dot_dimension_numbers<[1], [1], [0], [0], [0, 0, 1, 0], [], []>} : vector<16x8xf32>, vector<16x8xf32>, vector<16x16xf32> -> vector<16x16xf32>
    %18 = arith.addf %17, %9 : vector<16x16xf32>
    %cst_15 = arith.constant dense<0xFF800000> : vector<16xf32>
    %19 = vector.multi_reduction <maximumf>, %18, %cst_15 [1] : vector<16x16xf32> to vector<16xf32>
    %20 = vector.shape_cast %19 : vector<16xf32> to vector<16x1xf32>
    %21 = vector.broadcast %20 : vector<16x1xf32> to vector<16x16xf32>
    %22 = arith.subf %18, %21 : vector<16x16xf32>
    %23 = math.exp %22 : vector<16x16xf32>
    %cst_16 = arith.constant dense<0.000000e+00> : vector<16xf32>
    %24 = vector.multi_reduction <add>, %23, %cst_16 [1] : vector<16x16xf32> to vector<16xf32>
    %25 = vector.shape_cast %24 : vector<16xf32> to vector<16x1xf32>
    %26 = vector.broadcast %25 : vector<16x1xf32> to vector<16x16xf32>
    %27 = arith.divf %23, %26 : vector<16x16xf32>
    %cst_17 = arith.constant dense<0.000000e+00> : vector<16x8xf32>
    %28 = tpu.matmul %27, %16, %cst_17 {dimension_numbers = #tpu.dot_dimension_numbers<[1], [0], [0], [1], [0, 0, 1, 1], [], []>} : vector<16x16xf32>, vector<16x8xf32>, vector<16x8xf32> -> vector<16x8xf32>
    %29 = vector.extract_strided_slice %13 {offsets = [0, 8], sizes = [16, 8], strides = [1, 1]} : vector<16x96xf32> to vector<16x8xf32>
    %30 = vector.extract_strided_slice %13 {offsets = [0, 40], sizes = [16, 8], strides = [1, 1]} : vector<16x96xf32> to vector<16x8xf32>
    %31 = vector.extract_strided_slice %13 {offsets = [0, 72], sizes = [16, 8], strides = [1, 1]} : vector<16x96xf32> to vector<16x8xf32>
    %cst_18 = arith.constant dense<0.000000e+00> : vector<16x16xf32>
    %32 = tpu.matmul %29, %30, %cst_18 {dimension_numbers = #tpu.dot_dimension_numbers<[1], [1], [0], [0], [0, 0, 1, 0], [], []>} : vector<16x8xf32>, vector<16x8xf32>, vector<16x16xf32> -> vector<16x16xf32>
    %33 = arith.addf %32, %9 : vector<16x16xf32>
    %cst_19 = arith.constant dense<0xFF800000> : vector<16xf32>
    %34 = vector.multi_reduction <maximumf>, %33, %cst_19 [1] : vector<16x16xf32> to vector<16xf32>
    %35 = vector.shape_cast %34 : vector<16xf32> to vector<16x1xf32>
    %36 = vector.broadcast %35 : vector<16x1xf32> to vector<16x16xf32>
    %37 = arith.subf %33, %36 : vector<16x16xf32>
    %38 = math.exp %37 : vector<16x16xf32>
    %cst_20 = arith.constant dense<0.000000e+00> : vector<16xf32>
    %39 = vector.multi_reduction <add>, %38, %cst_20 [1] : vector<16x16xf32> to vector<16xf32>
    %40 = vector.shape_cast %39 : vector<16xf32> to vector<16x1xf32>
    %41 = vector.broadcast %40 : vector<16x1xf32> to vector<16x16xf32>
    %42 = arith.divf %38, %41 : vector<16x16xf32>
    %cst_21 = arith.constant dense<0.000000e+00> : vector<16x8xf32>
    %43 = tpu.matmul %42, %31, %cst_21 {dimension_numbers = #tpu.dot_dimension_numbers<[1], [0], [0], [1], [0, 0, 1, 1], [], []>} : vector<16x16xf32>, vector<16x8xf32>, vector<16x8xf32> -> vector<16x8xf32>
    %44 = vector.extract_strided_slice %13 {offsets = [0, 16], sizes = [16, 8], strides = [1, 1]} : vector<16x96xf32> to vector<16x8xf32>
    %45 = vector.extract_strided_slice %13 {offsets = [0, 48], sizes = [16, 8], strides = [1, 1]} : vector<16x96xf32> to vector<16x8xf32>
    %46 = vector.extract_strided_slice %13 {offsets = [0, 80], sizes = [16, 8], strides = [1, 1]} : vector<16x96xf32> to vector<16x8xf32>
    %cst_22 = arith.constant dense<0.000000e+00> : vector<16x16xf32>
    %47 = tpu.matmul %44, %45, %cst_22 {dimension_numbers = #tpu.dot_dimension_numbers<[1], [1], [0], [0], [0, 0, 1, 0], [], []>} : vector<16x8xf32>, vector<16x8xf32>, vector<16x16xf32> -> vector<16x16xf32>
    %48 = arith.addf %47, %9 : vector<16x16xf32>
    %cst_23 = arith.constant dense<0xFF800000> : vector<16xf32>
    %49 = vector.multi_reduction <maximumf>, %48, %cst_23 [1] : vector<16x16xf32> to vector<16xf32>
    %50 = vector.shape_cast %49 : vector<16xf32> to vector<16x1xf32>
    %51 = vector.broadcast %50 : vector<16x1xf32> to vector<16x16xf32>
    %52 = arith.subf %48, %51 : vector<16x16xf32>
    %53 = math.exp %52 : vector<16x16xf32>
    %cst_24 = arith.constant dense<0.000000e+00> : vector<16xf32>
    %54 = vector.multi_reduction <add>, %53, %cst_24 [1] : vector<16x16xf32> to vector<16xf32>
    %55 = vector.shape_cast %54 : vector<16xf32> to vector<16x1xf32>
    %56 = vector.broadcast %55 : vector<16x1xf32> to vector<16x16xf32>
    %57 = arith.divf %53, %56 : vector<16x16xf32>
    %cst_25 = arith.constant dense<0.000000e+00> : vector<16x8xf32>
    %58 = tpu.matmul %57, %46, %cst_25 {dimension_numbers = #tpu.dot_dimension_numbers<[1], [0], [0], [1], [0, 0, 1, 1], [], []>} : vector<16x16xf32>, vector<16x8xf32>, vector<16x8xf32> -> vector<16x8xf32>
    %59 = vector.extract_strided_slice %13 {offsets = [0, 24], sizes = [16, 8], strides = [1, 1]} : vector<16x96xf32> to vector<16x8xf32>
    %60 = vector.extract_strided_slice %13 {offsets = [0, 56], sizes = [16, 8], strides = [1, 1]} : vector<16x96xf32> to vector<16x8xf32>
    %61 = vector.extract_strided_slice %13 {offsets = [0, 88], sizes = [16, 8], strides = [1, 1]} : vector<16x96xf32> to vector<16x8xf32>
    %cst_26 = arith.constant dense<0.000000e+00> : vector<16x16xf32>
    %62 = tpu.matmul %59, %60, %cst_26 {dimension_numbers = #tpu.dot_dimension_numbers<[1], [1], [0], [0], [0, 0, 1, 0], [], []>} : vector<16x8xf32>, vector<16x8xf32>, vector<16x16xf32> -> vector<16x16xf32>
    %63 = arith.addf %62, %9 : vector<16x16xf32>
    %cst_27 = arith.constant dense<0xFF800000> : vector<16xf32>
    %64 = vector.multi_reduction <maximumf>, %63, %cst_27 [1] : vector<16x16xf32> to vector<16xf32>
    %65 = vector.shape_cast %64 : vector<16xf32> to vector<16x1xf32>
    %66 = vector.broadcast %65 : vector<16x1xf32> to vector<16x16xf32>
    %67 = arith.subf %63, %66 : vector<16x16xf32>
    %68 = math.exp %67 : vector<16x16xf32>
    %cst_28 = arith.constant dense<0.000000e+00> : vector<16xf32>
    %69 = vector.multi_reduction <add>, %68, %cst_28 [1] : vector<16x16xf32> to vector<16xf32>
    %70 = vector.shape_cast %69 : vector<16xf32> to vector<16x1xf32>
    %71 = vector.broadcast %70 : vector<16x1xf32> to vector<16x16xf32>
    %72 = arith.divf %68, %71 : vector<16x16xf32>
    %cst_29 = arith.constant dense<0.000000e+00> : vector<16x8xf32>
    %73 = tpu.matmul %72, %61, %cst_29 {dimension_numbers = #tpu.dot_dimension_numbers<[1], [0], [0], [1], [0, 0, 1, 1], [], []>} : vector<16x16xf32>, vector<16x8xf32>, vector<16x8xf32> -> vector<16x8xf32>
    %74 = tpu.concatenate %28, %43, %58, %73 in 1 : vector<16x8xf32>, vector<16x8xf32>, vector<16x8xf32>, vector<16x8xf32> -> vector<16x32xf32>
    %c0_30 = arith.constant 0 : index
    %c0_31 = arith.constant 0 : index
    %75 = vector.load %arg4[%c0_30, %c0_31] : memref<32x32xf32, #tpu.memory_space<vmem>>, vector<32x32xf32>
    %cst_32 = arith.constant dense<0.000000e+00> : vector<16x32xf32>
    %76 = tpu.matmul %74, %75, %cst_32 {dimension_numbers = #tpu.dot_dimension_numbers<[1], [0], [0], [1], [0, 0, 1, 1], [], []>} : vector<16x32xf32>, vector<32x32xf32>, vector<16x32xf32> -> vector<16x32xf32>
    %77 = vector.broadcast %2 : vector<1x32xf32> to vector<16x32xf32>
    %78 = arith.addf %76, %77 : vector<16x32xf32>
    %79 = arith.addf %0, %78 : vector<16x32xf32>
    %cst_33 = arith.constant dense<0.000000e+00> : vector<16xf32>
    %80 = vector.multi_reduction <add>, %79, %cst_33 [1] : vector<16x32xf32> to vector<16xf32>
    %81 = vector.shape_cast %80 : vector<16xf32> to vector<16x1xf32>
    %cst_34 = arith.constant 3.200000e+01 : f32
    %82 = vector.broadcast %cst_34 : f32 to vector<16x1xf32>
    %83 = arith.divf %81, %82 : vector<16x1xf32>
    %84 = vector.broadcast %83 : vector<16x1xf32> to vector<16x32xf32>
    %85 = arith.subf %79, %84 : vector<16x32xf32>
    %86 = arith.mulf %85, %85 : vector<16x32xf32>
    %cst_35 = arith.constant dense<0.000000e+00> : vector<16xf32>
    %87 = vector.multi_reduction <add>, %86, %cst_35 [1] : vector<16x32xf32> to vector<16xf32>
    %88 = vector.shape_cast %87 : vector<16xf32> to vector<16x1xf32>
    %cst_36 = arith.constant 3.200000e+01 : f32
    %89 = vector.broadcast %cst_36 : f32 to vector<16x1xf32>
    %90 = arith.divf %88, %89 : vector<16x1xf32>
    %91 = vector.broadcast %83 : vector<16x1xf32> to vector<16x32xf32>
    %92 = arith.subf %79, %91 : vector<16x32xf32>
    %cst_37 = arith.constant 9.99999974E-6 : f32
    %93 = vector.broadcast %cst_37 : f32 to vector<16x1xf32>
    %94 = arith.addf %90, %93 : vector<16x1xf32>
    %95 = math.rsqrt %94 : vector<16x1xf32>
    %96 = vector.broadcast %95 : vector<16x1xf32> to vector<16x32xf32>
    %97 = arith.mulf %92, %96 : vector<16x32xf32>
    %98 = vector.broadcast %5 : vector<1x32xf32> to vector<16x32xf32>
    %99 = arith.mulf %97, %98 : vector<16x32xf32>
    %100 = vector.broadcast %6 : vector<1x32xf32> to vector<16x32xf32>
    %101 = arith.addf %99, %100 : vector<16x32xf32>
    %c0_38 = arith.constant 0 : index
    %c0_39 = arith.constant 0 : index
    %102 = vector.load %arg5[%c0_38, %c0_39] : memref<32x64xf32, #tpu.memory_space<vmem>>, vector<32x64xf32>
    %cst_40 = arith.constant dense<0.000000e+00> : vector<16x64xf32>
    %103 = tpu.matmul %101, %102, %cst_40 {dimension_numbers = #tpu.dot_dimension_numbers<[1], [0], [0], [1], [0, 0, 1, 1], [], []>} : vector<16x32xf32>, vector<32x64xf32>, vector<16x64xf32> -> vector<16x64xf32>
    %104 = vector.broadcast %3 : vector<1x64xf32> to vector<16x64xf32>
    %105 = arith.addf %103, %104 : vector<16x64xf32>
    %cst_41 = arith.constant 0.000000e+00 : f32
    %106 = vector.broadcast %cst_41 : f32 to vector<16x64xf32>
    %107 = arith.maximumf %105, %106 : vector<16x64xf32>
    %c0_42 = arith.constant 0 : index
    %c0_43 = arith.constant 0 : index
    %108 = vector.load %arg6[%c0_42, %c0_43] : memref<64x32xf32, #tpu.memory_space<vmem>>, vector<64x32xf32>
    %cst_44 = arith.constant dense<0.000000e+00> : vector<16x32xf32>
    %109 = tpu.matmul %107, %108, %cst_44 {dimension_numbers = #tpu.dot_dimension_numbers<[1], [0], [0], [1], [0, 0, 1, 1], [], []>} : vector<16x64xf32>, vector<64x32xf32>, vector<16x32xf32> -> vector<16x32xf32>
    %110 = vector.broadcast %4 : vector<1x32xf32> to vector<16x32xf32>
    %111 = arith.addf %109, %110 : vector<16x32xf32>
    %112 = arith.addf %101, %111 : vector<16x32xf32>
    %cst_45 = arith.constant dense<0.000000e+00> : vector<16xf32>
    %113 = vector.multi_reduction <add>, %112, %cst_45 [1] : vector<16x32xf32> to vector<16xf32>
    %114 = vector.shape_cast %113 : vector<16xf32> to vector<16x1xf32>
    %cst_46 = arith.constant 3.200000e+01 : f32
    %115 = vector.broadcast %cst_46 : f32 to vector<16x1xf32>
    %116 = arith.divf %114, %115 : vector<16x1xf32>
    %117 = vector.broadcast %116 : vector<16x1xf32> to vector<16x32xf32>
    %118 = arith.subf %112, %117 : vector<16x32xf32>
    %119 = arith.mulf %118, %118 : vector<16x32xf32>
    %cst_47 = arith.constant dense<0.000000e+00> : vector<16xf32>
    %120 = vector.multi_reduction <add>, %119, %cst_47 [1] : vector<16x32xf32> to vector<16xf32>
    %121 = vector.shape_cast %120 : vector<16xf32> to vector<16x1xf32>
    %cst_48 = arith.constant 3.200000e+01 : f32
    %122 = vector.broadcast %cst_48 : f32 to vector<16x1xf32>
    %123 = arith.divf %121, %122 : vector<16x1xf32>
    %124 = vector.broadcast %116 : vector<16x1xf32> to vector<16x32xf32>
    %125 = arith.subf %112, %124 : vector<16x32xf32>
    %cst_49 = arith.constant 9.99999974E-6 : f32
    %126 = vector.broadcast %cst_49 : f32 to vector<16x1xf32>
    %127 = arith.addf %123, %126 : vector<16x1xf32>
    %128 = math.rsqrt %127 : vector<16x1xf32>
    %129 = vector.broadcast %128 : vector<16x1xf32> to vector<16x32xf32>
    %130 = arith.mulf %125, %129 : vector<16x32xf32>
    %131 = vector.broadcast %7 : vector<1x32xf32> to vector<16x32xf32>
    %132 = arith.mulf %130, %131 : vector<16x32xf32>
    %133 = vector.broadcast %8 : vector<1x32xf32> to vector<16x32xf32>
    %134 = arith.addf %132, %133 : vector<16x32xf32>
    %c0_50 = arith.constant 0 : index
    %c0_51 = arith.constant 0 : index
    %135 = vector.load %arg8[%c0_50, %c0_51] : memref<16x32xf32, #tpu.memory_space<vmem>>, vector<16x32xf32>
    tpu.vector_store %arg8[%c0_50, %c0_51], %134 {strides = array<i32>} : memref<16x32xf32, #tpu.memory_space<vmem>>, vector<16x32xf32>,
    return
  }
  func.func @transform_0(%arg0: i32) -> (i32, i32) {
    %c0_i32 = arith.constant 0 : i32
    %c0_i32_0 = arith.constant 0 : i32
    %c0_i32_1 = arith.constant 0 : i32
    return %c0_i32, %c0_i32_0 : i32, i32
  }
  func.func @transform_1(%arg0: i32) -> (i32, i32) {
    %c0_i32 = arith.constant 0 : i32
    %c0_i32_0 = arith.constant 0 : i32
    %c0_i32_1 = arith.constant 0 : i32
    return %c0_i32, %c0_i32_0 : i32, i32
  }
  func.func @transform_2(%arg0: i32) -> (i32, i32) {
    %c0_i32 = arith.constant 0 : i32
    %c0_i32_0 = arith.constant 0 : i32
    %c0_i32_1 = arith.constant 0 : i32
    return %c0_i32, %c0_i32_0 : i32, i32
  }
  func.func @transform_3(%arg0: i32) -> (i32, i32) {
    %c0_i32 = arith.constant 0 : i32
    %c0_i32_0 = arith.constant 0 : i32
    %c0_i32_1 = arith.constant 0 : i32
    return %c0_i32, %c0_i32_0 : i32, i32
  }
  func.func @transform_4(%arg0: i32) -> (i32, i32) {
    %c0_i32 = arith.constant 0 : i32
    %c0_i32_0 = arith.constant 0 : i32
    %c0_i32_1 = arith.constant 0 : i32
    return %c0_i32, %c0_i32_0 : i32, i32
  }
  func.func @transform_5(%arg0: i32) -> (i32, i32) {
    %c0_i32 = arith.constant 0 : i32
    %c0_i32_0 = arith.constant 0 : i32
    %c0_i32_1 = arith.constant 0 : i32
    return %c0_i32, %c0_i32_0 : i32, i32
  }
  func.func @transform_6(%arg0: i32) -> (i32, i32) {
    %c0_i32 = arith.constant 0 : i32
    %c0_i32_0 = arith.constant 0 : i32
    %c0_i32_1 = arith.constant 0 : i32
    return %c0_i32, %c0_i32_0 : i32, i32
  }
  func.func @transform_7(%arg0: i32) -> (i32, i32) {
    %c0_i32 = arith.constant 0 : i32
    %c0_i32_0 = arith.constant 0 : i32
    %c0_i32_1 = arith.constant 0 : i32
    return %c0_i32, %c0_i32_0 : i32, i32
  }
}

</mosaic_0001>

<bundles_post_ra>
// kernel: tpu_custom_call.1
= control target key start
LH: loop header
LB: loop body
LE: loop exit
PB: predicated region body
PF: predicated region fallthrough
CT: control target
= control target key end

     0   :  { %12 = vsyncpa [#allocation3], 0  ;;  %s1985_s0 = inlined_call_operand.hbm [shape: f32[16,32], index: 0, kind: input, shape index: {}]   ;;  %s1986_s1 = inlined_call_operand.hbm [shape: f32[16,16], index: 1, kind: input, shape index: {}]   ;;  %s1987_s2 = inlined_call_operand.vmem [shape: f32[32,96], index: 2, kind: input, shape index: {}]   ;;  %s1988_s3 = inlined_call_operand.vmem [shape: f32[32,32], index: 3, kind: input, shape index: {}]   ;;  %s1989_s4 = inlined_call_operand.vmem [shape: f32[32,64], index: 4, kind: input, shape index: {}]   ;;  %s1990_s5 = inlined_call_operand.vmem [shape: f32[64,32], index: 5, kind: input, shape index: {}]   ;;  %s1991_s6 = inlined_call_operand.vmem [shape: f32[8,128], index: 6, kind: input, shape index: {}]   ;;  %s1992_s7 = inlined_call_operand.hbm [shape: f32[16,32], index: 7, kind: output, shape index: {}]  }
   0x1   :  { %13 = vsyncpa [#allocation6], 0 }
   0x2   :  { %14 = vsyncpa [#allocation4], 0  ;;  %s1695_s24 = smov [#allocation2]  }
   0x3   :  { %s20_s25 = sshll.u32 %s1695_s24, 4  ;;  %s21_s25 = int_to_ptr.vmem [resolvable:$true] %s20_s25 }
   0x4   :  { %s1637_s26 = scalar_lea.vmem %s21_s25, 256  ;;  %p1642_p1 = scmp.lt.s32.totalorder %s21_s25, %s21_s25 }
   0x5   :  { %p1638_p0 = scmp.ne.s32.totalorder %s21_s25, %s1637_s26  ;;  %p1643_p2 = scmp.lt.s32.totalorder %s1637_s26, %s1637_s26 }
   0x7   :  { %p1644_p3 = por %p1643_p2, %p1642_p1 }
   0x9   :  { %p1645_p4 = pnand %p1644_p3, %p1638_p0 }
   0xb   :  { %1648 = shalt.err (!%p1645_p4)
}
   0xc   :  { %s1696_s27 = smov 128   ;;  %s1697_s28 = smov 8  }
   0xd   :  { %26 = dma.hbm_to_vmem [thread:$0]  %s1985_s0, 256, %s21_s25, [#allocation3], %s1696_s27, %s1696_s27, %s1697_s28  }
   0xe   :  { %s1698_s8 = smov [#allocation5]  }
   0xf   :  { %s32_s9 = sshll.u32 %s1698_s8, 4  ;;  %s33_s9 = int_to_ptr.vmem [resolvable:$true] %s32_s9 }
  0x10   :  { %s1657_s10 = scalar_lea.vmem %s33_s9, 256  ;;  %p1662_p6 = scmp.lt.s32.totalorder %s33_s9, %s33_s9 }
  0x11   :  { %p1658_p5 = scmp.ne.s32.totalorder %s33_s9, %s1657_s10  ;;  %p1663_p7 = scmp.lt.s32.totalorder %s1657_s10, %s1657_s10 }
  0x13   :  { %p1664_p8 = por %p1663_p7, %p1662_p6 }
  0x15   :  { %p1665_p9 = pnand %p1664_p8, %p1658_p5 }
  0x17   :  { %1668 = shalt.err (!%p1665_p9)
}
  0x18   :  { %38 = dma.hbm_to_vmem [thread:$0]  %s1986_s1, 256, %s33_s9, [#allocation6], %s1696_s27, %s1696_s27, %s1697_s28  }
  0x19   :  { %1689 = dma.done.wait [#allocation3], 256  }
  0x1a   :  { %1690 = vsyncadd [#allocation3], 4294967040 }
  0x1b   :  { %1691 = dma.done.wait [#allocation6], 256  }
  0x1c   :  { %1692 = vsyncadd [#allocation6], 4294967040  ;;  %vm75_vm0 = vcmask 261120   ;;  %v70_v0 = vld [vmem:[%s1987_s2 + $0x18] sm:$0xff]  ;;  %v69_v1 = vld [vmem:[%s1987_s2 + $0x10] sm:$0xff]  ;;  %vm163_vm1 = vcmask 64512  }
  0x1d   :  { %1463 = vmatprep.subr.mxu1 %v70_v0  ;;  %v1771_v2 = vld [vmem:[#allocation2] sm:$0xff]  ;;  %v68_v3 = vld [vmem:[%s1987_s2 + $0x8] sm:$0xff]  ;;  %s1700_s21 = smov 96   ;;  %s1701_s22 = smov 120   ;;  %v1812_v17 = vld [vmem:[#allocation5 + $0x8] sm:$0xff]  ;;  %vm247_vm2 = vcmask 130048  }
  0x1e   :  { %1464 = vmatpush3.msra.mxu1 %v70_v0  ;;  %1471 = vmatprep.mubr.msk.f32.mxu1 %vm75_vm0, %v1771_v2  ;;  %v67_v4 = vld [vmem:[%s1987_s2] sm:$0xff]  ;;  %v1781_v5 = vld [vmem:[#allocation2 + $0x8] sm:$0xff]  ;;  %s1699_s2 = smov 88   ;;  %v1814_v19 = vld [vmem:[#allocation5] sm:$0xff]  ;;  %s1702_s23 = smov 64   ;;  %vm985_vm3 = vcmask 195584  }
  0x1f   :  { %1465 = vmatprep.subr.mxu1 %v69_v1  ;;  %v1363_v6 = vld [vmem:[%s1991_s6] ss:$0 sm:$0xff]  ;;  %s1703_s24 = smov 56   ;;  %s1704_s25 = smov 80   ;;  %vm1221_vm4 = vcmask 523264  }
  0x20   :  { %1466 = vmatpush3.msra.mxu1 %v69_v1  ;;  %s1705_s26 = smov 112   ;;  %s1706_s29 = smov 48  }
  0x21   :  { %1467 = vmatprep.subr.mxu1 %v68_v3  ;;  %s1707_s30 = smov 72   ;;  %s1708_s8 = smov 104  }
  0x22   :  { %1468 = vmatpush3.msra.mxu1 %v68_v3  ;;  %s1709_s9 = smov 40   ;;  %s1710_s10 = smov 16  }
  0x23   :  { %1469 = vmatprep.subr.mxu1 %v67_v4  ;;  %s1711_s1 = smov 24  }
  0x24   :  { %1470 = vmatpush3.msra.mxu1 %v67_v4 }
  0x25   :  { %1472 = vmatmul.mubr.msk.f32.vlgmr.msra.gmra.mxu1 %vm75_vm0, %v1781_v5 }
  0xe5   :  { %v1473_v7 = vpop.f32.mrf.mxu1 }
  0xe6   :  { %v1788_v8 = vadd.f32 %v1473_v7, %v1363_v6 }
  0xe7   :  { %v148_v9 = vpop.f32.mrf.mxu1 }
  0xe8   :  { %v1790_v10 = vadd.f32 %v1363_v6, %v148_v9  ;;  %363 = vrot.lane.b32.xlu1 %v1788_v8, %s1699_s2  ;;  %161 = vrot.lane.b32.xlu0 %v1788_v8, %s1700_s21 }
  0xea   :  { %1478 = vmatprep.mubr.msk.f32.mxu1 %vm163_vm1, %v1790_v10 }
  0xec   :  { %361 = vrot.lane.b32.xlu1 %v1790_v10, %s1699_s2  ;;  %159 = vrot.lane.b32.xlu0 %v1790_v10, %s1700_s21 }
  0xf0   :  { %359 = vrot.lane.b32.xlu1 %v1788_v8, %s1701_s22  ;;  %357 = vrot.lane.b32.xlu0 %v1790_v10, %s1701_s22 }
 0x15a   :  { %v162_v11 = vpop.permute.xlu0 %161  ;;  %v364_v12 = vpop.permute.xlu1 %363 }
 0x15b   :  { %1474 = vmatprep.subr.msk.mxu1 %vm163_vm1, %v162_v11 }
 0x15c   :  { %1475 = vmatpush3.xpose.msk.msra.mxu1 %vm163_vm1, %v162_v11 }
 0x15e   :  { %v160_v13 = vpop.permute.xlu0 %159  ;;  %v362_v15 = vpop.permute.xlu1 %361 }
 0x15f   :  { %1476 = vmatprep.subr.msk.mxu1 %vm163_vm1, %v160_v13 }
 0x160   :  { %1477 = vmatpush3.xpose.msk.msra.mxu1 %vm163_vm1, %v160_v13 }
 0x161   :  { %1488 = vmatprep.subr.msk.mxu1 %vm163_vm1, %v364_v12 }
 0x162   :  { %v358_v14 = vpop.permute.xlu0 %357  ;;  %v360_v16 = vpop.permute.xlu1 %359 }
 0x163   :  { %1479 = vmatmul.mubr.msk.f32.vlgmr.msra.gmra.mxu1 %vm163_vm1, %v1788_v8 }
 0x164   :  { %1489 = vmatpush3.xpose.msk.msra.mxu1 %vm163_vm1, %v364_v12  ;;  %1492 = vmatprep.mubr.msk.f32.mxu1 %vm163_vm1, %v358_v14 }
 0x165   :  { %1490 = vmatprep.subr.msk.mxu1 %vm163_vm1, %v362_v15 }
 0x168   :  { %1491 = vmatpush3.xpose.msk.msra.mxu1 %vm163_vm1, %v362_v15 }
 0x16b   :  { %1493 = vmatmul.mubr.msk.f32.vlgmr.msra.gmra.mxu1 %vm163_vm1, %v360_v16 }
 0x223   :  { %v1480_v18 = vpop.f32.mrf.mxu1 }
 0x224   :  { %v244_v20 = vadd.f32 %v1480_v18, %v1812_v17 }
 0x225   :  { %v238_v21 = vpop.f32.mrf.mxu1 }
 0x226   :  { %v239_v22 = vadd.f32 %v238_v21, %v1814_v19  ;;  %v251_v23 = vsel %vm247_vm2, %v244_v20, -inf }
 0x227   :  { %252 = vmax.xlane.f32.xlu1 %v251_v23 }
 0x228   :  { %v248_v24 = vsel %vm247_vm2, %v239_v22, -inf }
 0x229   :  { %249 = vmax.xlane.f32.xlu0 %v248_v24 }
 0x22b   :  { %v1494_v25 = vpop.f32.mrf.mxu1 }
 0x22c   :  { %v445_v28 = vadd.f32 %v1494_v25, %v1812_v17 }
 0x22d   :  { %v439_v26 = vpop.f32.mrf.mxu1 }
 0x22e   :  { %v440_v27 = vadd.f32 %v439_v26, %v1814_v19  ;;  %v451_v30 = vsel %vm247_vm2, %v445_v28, -inf }
 0x230   :  { %v448_v29 = vsel %vm247_vm2, %v440_v27, -inf }
 0x231   :  { %449 = vmax.xlane.f32.xlu0 %v448_v29 }
 0x235   :  { %452 = vmax.xlane.f32.xlu0 %v451_v30 }
 0x238   :  { %272 = vrot.lane.b32.xlu1 %v1788_v8, %s1702_s23 }
 0x23c   :  { %472 = vrot.lane.b32.xlu1 %v1788_v8, %s1703_s24 }
 0x240   :  { %470 = vrot.lane.b32.xlu1 %v1790_v10, %s1703_s24 }
 0x24b   :  { %270 = vrot.lane.b32.xlu0 %v1790_v10, %s1702_s23 }
 0x2b0   :  { %v253_v31 = vpop.xlane.xlu1 %252 }
 0x2b1   :  { %v255_v32 = vsub.f32 %v244_v20, %v253_v31 }
 0x2b2   :  { %v250_v33 = vpop.xlane.xlu0 %249 }
 0x2b3   :  { %v258_v34 = vmul.f32 1.442695, %v255_v32  ;;  %v254_v35 = vsub.f32 %v239_v22, %v250_v33 }
 0x2b4   :  { %v273_v36 = vpop.permute.xlu1 %272 }
 0x2b5   :  { %1589 = vpow2.f32 %v258_v34  ;;  %v256_v37 = vmul.f32 1.442695, %v254_v35  ;;  %1481 = vmatprep.subr.mxu0 %v273_v36 }
 0x2b6   :  { %1482 = vmatpush3.msra.mxu0 %v273_v36 }
 0x2b7   :  { %1591 = vpow2.f32 %v256_v37 }
 0x2b8   :  { %v473_v46 = vpop.permute.xlu1 %472 }
 0x2ba   :  { %v450_v38 = vpop.xlane.xlu0 %449 }
 0x2bb   :  { %v454_v50 = vsub.f32 %v440_v27, %v450_v38 }
 0x2bc   :  { %v471_v54 = vpop.permute.xlu1 %470 }
 0x2bd   :  { %v456_v51 = vmul.f32 1.442695, %v454_v50 }
 0x2be   :  { %v453_v39 = vpop.xlane.xlu0 %452 }
 0x2bf   :  { %v455_v40 = vsub.f32 %v445_v28, %v453_v39 }
 0x2c1   :  { %v458_v41 = vmul.f32 1.442695, %v455_v40 }
 0x2c2   :  { %v1590_v42 = vpop.eup %1589  ;;  %v271_v43 = vpop.permute.xlu0 %270 }
 0x2c3   :  { %1593 = vpow2.f32 %v458_v41  ;;  %1483 = vmatprep.subr.mxu0 %v271_v43  ;;  %v263_v44 = vsel %vm247_vm2, %v1590_v42, 0.0 }
 0x2c4   :  { %v1592_v45 = vpop.eup %1591  ;;  %264 = vadd.xlane.f32.xlu0 %v263_v44  ;;  %1484 = vmatpush3.msra.mxu0 %v271_v43  ;;  %1595 = vpow2.f32 %v456_v51 }
 0x2c5   :  { %1495 = vmatprep.subr.mxu0 %v473_v46  ;;  %v260_v47 = vsel %vm247_vm2, %v1592_v45, 0.0 }
 0x2c6   :  { %261 = vadd.xlane.f32.xlu1 %v260_v47 }
 0x2d0   :  { %v1594_v48 = vpop.eup %1593 }
 0x2d1   :  { %v463_v49 = vsel %vm247_vm2, %v1594_v48, 0.0  ;;  %v1596_v52 = vpop.eup %1595 }
 0x2d2   :  { %464 = vadd.xlane.f32.xlu0 %v463_v49  ;;  %v460_v53 = vsel %vm247_vm2, %v1596_v52, 0.0 }
 0x2d7   :  { %561 = vrot.lane.b32.xlu1 %v1790_v10, %s1704_s25 }
 0x2e8   :  { %563 = vrot.lane.b32.xlu0 %v1788_v8, %s1704_s25 }
 0x2ec   :  { %557 = vrot.lane.b32.xlu0 %v1790_v10, %s1705_s26 }
 0x2fb   :  { %461 = vadd.xlane.f32.xlu1 %v460_v53 }
 0x30c   :  { %559 = vrot.lane.b32.xlu1 %v1788_v8, %s1705_s26 }
 0x34d   :  { %v265_v55 = vpop.xlane.xlu0 %264 }
 0x34e   :  { %1597 = vrcp.f32 %v265_v55 }
 0x34f   :  { %v262_v56 = vpop.xlane.xlu1 %261 }
 0x350   :  { %1599 = vrcp.f32 %v262_v56 }
 0x353   :  { %v562_v63 = vpop.permute.xlu1 %561 }
 0x35b   :  { %v1598_v57 = vpop.eup %1597  ;;  %v465_v59 = vpop.xlane.xlu0 %464 }
 0x35c   :  { %v269_v61 = vmul.f32 %v1598_v57, %v1590_v42  ;;  %1601 = vrcp.f32 %v465_v59 }
 0x35d   :  { %v1600_v58 = vpop.eup %1599 }
 0x35e   :  { %v267_v60 = vmul.f32 %v1600_v58, %v1592_v45 }
 0x35f   :  { %v564_v62 = vpop.permute.xlu0 %563 }
 0x360   :  { %1485 = vmatprep.mubr.msk.f32.mxu0 %vm247_vm2, %v267_v60 }
 0x361   :  { %1486 = vmatmul.mubr.msk.f32.vlgmr.msra.gmra.mxu0 %vm247_vm2, %v269_v61 }
 0x362   :  { %1496 = vmatpush3.msra.mxu0 %v473_v46 }
 0x363   :  { %1497 = vmatprep.subr.mxu0 %v471_v54  ;;  %v558_v7 = vpop.permute.xlu0 %557 }
 0x364   :  { %1498 = vmatpush3.msra.mxu0 %v471_v54 }
 0x365   :  { %1502 = vmatprep.subr.msk.mxu0 %vm163_vm1, %v564_v62 }
 0x369   :  { %v1602_v1 = vpop.eup %1601 }
 0x36a   :  { %v469_v6 = vmul.f32 %v1602_v1, %v1594_v48 }
 0x384   :  { %v462_v0 = vpop.xlane.xlu1 %461 }
 0x385   :  { %1603 = vrcp.f32 %v462_v0 }
 0x388   :  { %v560_v9 = vpop.permute.xlu1 %559 }
 0x392   :  { %v1604_v3 = vpop.eup %1603 }
 0x393   :  { %v467_v4 = vmul.f32 %v1604_v3, %v1596_v52 }
 0x395   :  { %1499 = vmatprep.mubr.msk.f32.mxu0 %vm247_vm2, %v467_v4 }
 0x396   :  { %1500 = vmatmul.mubr.msk.f32.vlgmr.msra.gmra.mxu0 %vm247_vm2, %v469_v6  ;;  %v990_v6 = vld [vmem:[%s1988_s3 + $0x10] sm:$0xff] }
 0x397   :  { %1503 = vmatpush3.xpose.msk.msra.mxu0 %vm163_vm1, %v564_v62  ;;  %1506 = vmatprep.mubr.msk.f32.mxu0 %vm163_vm1, %v558_v7  ;;  %v989_v7 = vld [vmem:[%s1988_s3 + $0x8] sm:$0xff] }
 0x398   :  { %1504 = vmatprep.subr.msk.mxu0 %vm163_vm1, %v562_v63 }
 0x39b   :  { %1505 = vmatpush3.xpose.msk.msra.mxu0 %vm163_vm1, %v562_v63 }
 0x39e   :  { %1507 = vmatmul.mubr.msk.f32.vlgmr.msra.gmra.mxu0 %vm163_vm1, %v560_v9  ;;  %v988_v9 = vld [vmem:[%s1988_s3] sm:$0xff] }
 0x421   :  { %v1846_v11 = vpop.f32.mrf.mxu0 }
 0x423   :  { %v1848_v12 = vpop.f32.mrf.mxu0 }
 0x456   :  { %v1850_v13 = vpop.f32.mrf.mxu0 }
 0x458   :  { %v1852_v14 = vpop.f32.mrf.mxu0 }
 0x45e   :  { %v1508_v15 = vpop.f32.mrf.mxu0 }
 0x45f   :  { %v645_v16 = vadd.f32 %v1508_v15, %v1812_v17 }
 0x460   :  { %v639_v18 = vpop.f32.mrf.mxu0 }
 0x461   :  { %v640_v20 = vadd.f32 %v639_v18, %v1814_v19  ;;  %v651_v21 = vsel %vm247_vm2, %v645_v16, -inf }
 0x462   :  { %652 = vmax.xlane.f32.xlu1 %v651_v21 }
 0x463   :  { %v648_v22 = vsel %vm247_vm2, %v640_v20, -inf }
 0x464   :  { %649 = vmax.xlane.f32.xlu0 %v648_v22 }
 0x473   :  { %672 = vrot.lane.b32.xlu1 %v1788_v8, %s1706_s29 }
 0x477   :  { %763 = vrot.lane.b32.xlu1 %v1788_v8, %s1707_s30 }
 0x47b   :  { %761 = vrot.lane.b32.xlu1 %v1790_v10, %s1707_s30 }
 0x47f   :  { %759 = vrot.lane.b32.xlu1 %v1788_v8, %s1708_s8 }
 0x4eb   :  { %v653_v23 = vpop.xlane.xlu1 %652 }
 0x4ec   :  { %v655_v24 = vsub.f32 %v645_v16, %v653_v23 }
 0x4ed   :  { %v650_v25 = vpop.xlane.xlu0 %649 }
 0x4ee   :  { %v658_v26 = vmul.f32 1.442695, %v655_v24  ;;  %v654_v27 = vsub.f32 %v640_v20, %v650_v25 }
 0x4ef   :  { %v673_v28 = vpop.permute.xlu1 %672 }
 0x4f0   :  { %1605 = vpow2.f32 %v658_v26  ;;  %v656_v29 = vmul.f32 1.442695, %v654_v27  ;;  %1509 = vmatprep.subr.mxu1 %v673_v28 }
 0x4f1   :  { %1510 = vmatpush3.msra.mxu1 %v673_v28 }
 0x4f2   :  { %1607 = vpow2.f32 %v656_v29 }
 0x4f3   :  { %v764_v37 = vpop.permute.xlu1 %763 }
 0x4f7   :  { %v762_v43 = vpop.permute.xlu1 %761 }
 0x4fb   :  { %v760_v44 = vpop.permute.xlu1 %759 }
 0x4fd   :  { %v1606_v30 = vpop.eup %1605 }
 0x4fe   :  { %v663_v31 = vsel %vm247_vm2, %v1606_v30, 0.0 }
 0x4ff   :  { %v1608_v32 = vpop.eup %1607  ;;  %664 = vadd.xlane.f32.xlu0 %v663_v31 }
 0x500   :  { %v660_v33 = vsel %vm247_vm2, %v1608_v32, 0.0 }
 0x503   :  { %661 = vadd.xlane.f32.xlu0 %v660_v33 }
 0x519   :  { %670 = vrot.lane.b32.xlu0 %v1790_v10, %s1706_s29  ;;  %s1712_s29 = smov [#allocation7]  }
 0x51a   :  { %s1350_s30 = sshll.u32 %s1712_s29, 4  ;;  %s1351_s30 = int_to_ptr.vmem [resolvable:$true] %s1350_s30 }
 0x51b   :  { %p1674_p11 = scmp.lt.s32.totalorder %s1351_s30, %s1351_s30 }
 0x51d   :  { %757 = vrot.lane.b32.xlu0 %v1790_v10, %s1708_s8  ;;  %s1669_s8 = scalar_lea.vmem %s1351_s30, 256 }
 0x51e   :  { %p1670_p10 = scmp.ne.s32.totalorder %s1351_s30, %s1669_s8  ;;  %p1675_p12 = scmp.lt.s32.totalorder %s1669_s8, %s1669_s8 }
 0x520   :  { %p1676_p13 = por %p1675_p12, %p1674_p11 }
 0x522   :  { %p1677_p0 = pnand %p1676_p13, %p1670_p10 }
 0x588   :  { %v665_v34 = vpop.xlane.xlu0 %664 }
 0x589   :  { %1609 = vrcp.f32 %v665_v34 }
 0x58c   :  { %v662_v35 = vpop.xlane.xlu0 %661 }
 0x58d   :  { %1611 = vrcp.f32 %v662_v35 }
 0x590   :  { %v671_v36 = vpop.permute.xlu0 %670 }
 0x591   :  { %1511 = vmatprep.subr.mxu1 %v671_v36 }
 0x592   :  { %1512 = vmatpush3.msra.mxu1 %v671_v36 }
 0x593   :  { %1516 = vmatprep.subr.msk.mxu1 %vm163_vm1, %v764_v37 }
 0x594   :  { %v758_v42 = vpop.permute.xlu0 %757 }
 0x596   :  { %v1610_v38 = vpop.eup %1609 }
 0x597   :  { %v669_v41 = vmul.f32 %v1610_v38, %v1606_v30 }
 0x59a   :  { %v1612_v39 = vpop.eup %1611 }
 0x59b   :  { %v667_v40 = vmul.f32 %v1612_v39, %v1608_v32 }
 0x59d   :  { %1513 = vmatprep.mubr.msk.f32.mxu1 %vm247_vm2, %v667_v40 }
 0x59e   :  { %1514 = vmatmul.mubr.msk.f32.vlgmr.msra.gmra.mxu1 %vm247_vm2, %v669_v41 }
 0x59f   :  { %1517 = vmatpush3.xpose.msk.msra.mxu1 %vm163_vm1, %v764_v37  ;;  %1520 = vmatprep.mubr.msk.f32.mxu1 %vm163_vm1, %v758_v42 }
 0x5a0   :  { %1518 = vmatprep.subr.msk.mxu1 %vm163_vm1, %v762_v43 }
 0x5a3   :  { %1519 = vmatpush3.xpose.msk.msra.mxu1 %vm163_vm1, %v762_v43 }
 0x5a6   :  { %1521 = vmatmul.mubr.msk.f32.vlgmr.msra.gmra.mxu1 %vm163_vm1, %v760_v44 }
 0x65e   :  { %v1515_v45 = vpop.f32.mrf.mxu1 }
 0x660   :  { %v748_v46 = vpop.f32.mrf.mxu1 }
 0x666   :  { %v1522_v47 = vpop.f32.mrf.mxu1 }
 0x667   :  { %v845_v48 = vadd.f32 %v1522_v47, %v1812_v17  ;;  %v1118_v47 = vld [vmem:[%s1989_s4] sm:$0xff] }
 0x668   :  { %v839_v49 = vpop.f32.mrf.mxu1 }
 0x669   :  { %v840_v50 = vadd.f32 %v839_v49, %v1814_v19  ;;  %v851_v51 = vsel %vm247_vm2, %v845_v48, -inf  ;;  %v1215_v49 = vld [vmem:[%s1990_s5 + $0x30] sm:$0xff] }
 0x66a   :  { %852 = vmax.xlane.f32.xlu1 %v851_v51  ;;  %v1213_v51 = vld [vmem:[%s1990_s5 + $0x20] sm:$0xff] }
 0x66b   :  { %v848_v52 = vsel %vm247_vm2, %v840_v50, -inf }
 0x66c   :  { %849 = vmax.xlane.f32.xlu0 %v848_v52 }
 0x67b   :  { %872 = vrot.lane.b32.xlu1 %v1788_v8, %s1709_s9 }
 0x67f   :  { %959 = vrot.lane.b32.xlu1 %v1852_v14, %s1697_s28 }
 0x683   :  { %961 = vrot.lane.b32.xlu1 %v1850_v13, %s1697_s28 }
 0x687   :  { %969 = vrot.lane.b32.xlu1 %v1515_v45, %s1710_s10  ;;  %v1120_v45 = vld [vmem:[%s1989_s4 + $0x10] sm:$0xff] }
 0x6f3   :  { %v853_v17 = vpop.xlane.xlu1 %852 }
 0x6f4   :  { %v855_v53 = vsub.f32 %v845_v48, %v853_v17  ;;  %v1216_v48 = vld [vmem:[%s1990_s5 + $0x38] sm:$0xff] }
 0x6f5   :  { %v850_v19 = vpop.xlane.xlu0 %849 }
 0x6f6   :  { %v858_v54 = vmul.f32 1.442695, %v855_v53  ;;  %v854_v55 = vsub.f32 %v840_v50, %v850_v19  ;;  %v1214_v50 = vld [vmem:[%s1990_s5 + $0x28] sm:$0xff] }
 0x6f7   :  { %v873_v56 = vpop.permute.xlu1 %872 }
 0x6f8   :  { %1613 = vpow2.f32 %v858_v54  ;;  %v856_v57 = vmul.f32 1.442695, %v854_v55  ;;  %1523 = vmatprep.subr.mxu0 %v873_v56 }
 0x6f9   :  { %1524 = vmatpush3.msra.mxu0 %v873_v56 }
 0x6fa   :  { %1615 = vpow2.f32 %v856_v57  ;;  %v1393_v57 = vld [vmem:[%s1991_s6 + $0x4] ss:$0 sm:$0xff] }
 0x6fb   :  { %v960_v15 = vpop.permute.xlu1 %959 }
 0x6fc   :  { %v981_v21 = vsel %vm163_vm1, %v1848_v12, %v960_v15  ;;  %v1390_v12 = vld [vmem:[%s1991_s6 + $0x1] ss:$0 sm:$0xff] }
 0x6ff   :  { %v962_v16 = vpop.permute.xlu1 %961 }
 0x700   :  { %v982_v23 = vsel %vm163_vm1, %v1846_v11, %v962_v16 }
 0x703   :  { %v970_v18 = vpop.permute.xlu1 %969 }
 0x704   :  { %v984_v26 = vsel %vm247_vm2, %v982_v23, %v970_v18  ;;  %v1398_v18 = vld [vmem:[%s1991_s6 + $0x3] ss:$0 sm:$0xff] }
 0x705   :  { %v1614_v8 = vpop.eup %1613 }
 0x706   :  { %v863_v58 = vsel %vm247_vm2, %v1614_v8, 0.0 }
 0x707   :  { %v1616_v59 = vpop.eup %1615  ;;  %864 = vadd.xlane.f32.xlu0 %v863_v58  ;;  %v1394_v58 = vld [vmem:[%s1991_s6 + $0x5] ss:$0 sm:$0xff] }
 0x708   :  { %v860_v60 = vsel %vm247_vm2, %v1616_v59, 0.0 }
 0x70b   :  { %861 = vadd.xlane.f32.xlu0 %v860_v60 }
 0x721   :  { %870 = vrot.lane.b32.xlu0 %v1790_v10, %s1709_s9  ;;  %v991_v10 = vld [vmem:[%s1988_s3 + $0x18] sm:$0xff] }
 0x725   :  { %967 = vrot.lane.b32.xlu0 %v748_v46, %s1710_s10  ;;  %v1119_v46 = vld [vmem:[%s1989_s4 + $0x8] sm:$0xff] }
 0x790   :  { %v865_v61 = vpop.xlane.xlu0 %864 }
 0x791   :  { %1617 = vrcp.f32 %v865_v61 }
 0x794   :  { %v862_v62 = vpop.xlane.xlu0 %861 }
 0x795   :  { %1619 = vrcp.f32 %v862_v62 }
 0x798   :  { %v871_v63 = vpop.permute.xlu0 %870 }
 0x799   :  { %1525 = vmatprep.subr.mxu0 %v871_v63 }
 0x79a   :  { %1526 = vmatpush3.msra.mxu0 %v871_v63 }
 0x79b   :  { %1530 = vmatprep.subr.mxu0 %v991_v10 }
 0x79c   :  { %v968_v20 = vpop.permute.xlu0 %967 }
 0x79d   :  { %v983_v24 = vsel %vm247_vm2, %v981_v21, %v968_v20 }
 0x79e   :  { %v1618_v0 = vpop.eup %1617 }
 0x79f   :  { %v869_v4 = vmul.f32 %v1618_v0, %v1614_v8 }
 0x7a2   :  { %v1620_v1 = vpop.eup %1619 }
 0x7a3   :  { %v867_v3 = vmul.f32 %v1620_v1, %v1616_v59  ;;  %v1212_v1 = vld [vmem:[%s1990_s5 + $0x18] sm:$0xff] }
 0x7a5   :  { %1527 = vmatprep.mubr.msk.f32.mxu0 %vm247_vm2, %v867_v3  ;;  %v1211_v3 = vld [vmem:[%s1990_s5 + $0x10] sm:$0xff] }
 0x7a6   :  { %1528 = vmatmul.mubr.msk.f32.vlgmr.msra.gmra.mxu0 %vm247_vm2, %v869_v4  ;;  %v1210_v4 = vld [vmem:[%s1990_s5 + $0x8] sm:$0xff] }
 0x7a7   :  { %1531 = vmatpush3.msra.mxu0 %v991_v10  ;;  %v1209_v10 = vld [vmem:[%s1990_s5] sm:$0xff] }
 0x7a8   :  { %1532 = vmatprep.subr.mxu0 %v990_v6 }
 0x7a9   :  { %1533 = vmatpush3.msra.mxu0 %v990_v6  ;;  %v1395_v6 = vld [vmem:[%s1991_s6 + $0x2] ss:$0 sm:$0xff] }
 0x7aa   :  { %1534 = vmatprep.subr.mxu0 %v989_v7 }
 0x7ab   :  { %1535 = vmatpush3.msra.mxu0 %v989_v7 }
 0x7ac   :  { %1536 = vmatprep.subr.mxu0 %v988_v9 }
 0x7ad   :  { %1537 = vmatpush3.msra.mxu0 %v988_v9 }
 0x7ae   :  { %1552 = vmatprep.subr.mxu0 %v1216_v48 }
 0x866   :  { %v1529_v13 = vpop.f32.mrf.mxu0 }
 0x867   :  { %977 = vrot.lane.b32.xlu1 %v1529_v13, %s1711_s1 }
 0x868   :  { %v948_v14 = vpop.f32.mrf.mxu0 }
 0x869   :  { %975 = vrot.lane.b32.xlu0 %v948_v14, %s1711_s1 }
 0x8d9   :  { %v978_v22 = vpop.permute.xlu1 %977 }
 0x8da   :  { %v987_v28 = vsel %vm985_vm3, %v984_v26, %v978_v22 }
 0x8db   :  { %v976_v25 = vpop.permute.xlu0 %975 }
 0x8dc   :  { %v986_v27 = vsel %vm985_vm3, %v983_v24, %v976_v25 }
 0x8dd   :  { %1538 = vmatprep.mubr.msk.f32.mxu0 %vm75_vm0, %v986_v27 }
 0x8de   :  { %1539 = vmatmul.mubr.msk.f32.vlgmr.msra.gmra.mxu0 %vm75_vm0, %v987_v28 }
 0x8df   :  { %1553 = vmatpush3.msra.mxu0 %v1216_v48 }
 0x8e0   :  { %1554 = vmatprep.subr.mxu0 %v1215_v49 }
 0x8e1   :  { %1555 = vmatpush3.msra.mxu0 %v1215_v49 }
 0x8e2   :  { %1556 = vmatprep.subr.mxu0 %v1214_v50 }
 0x8e3   :  { %1557 = vmatpush3.msra.mxu0 %v1214_v50 }
 0x8e4   :  { %1558 = vmatprep.subr.mxu0 %v1213_v51 }
 0x8e5   :  { %1559 = vmatpush3.msra.mxu0 %v1213_v51 }
 0x8e6   :  { %1560 = vmatprep.subr.mxu0 %v1212_v1 }
 0x8e7   :  { %1561 = vmatpush3.msra.mxu0 %v1212_v1 }
 0x8e8   :  { %1562 = vmatprep.subr.mxu0 %v1211_v3 }
 0x8e9   :  { %1563 = vmatpush3.msra.mxu0 %v1211_v3 }
 0x8ea   :  { %1564 = vmatprep.subr.mxu0 %v1210_v4 }
 0x8eb   :  { %1565 = vmatpush3.msra.mxu0 %v1210_v4 }
 0x8ec   :  { %1566 = vmatprep.subr.mxu0 %v1209_v10 }
 0x8ed   :  { %1567 = vmatpush3.msra.mxu0 %v1209_v10 }
 0x99e   :  { %v1540_v29 = vpop.f32.mrf.mxu0 }
 0x99f   :  { %v1074_v30 = vadd.f32 %v1540_v29, %v1390_v12 }
 0x9a0   :  { %v1068_v31 = vpop.f32.mrf.mxu0 }
 0x9a1   :  { %v1069_v32 = vadd.f32 %v1390_v12, %v1068_v31  ;;  %v1078_v11 = vadd.f32 %v1074_v30, %v1781_v5 }
 0x9a3   :  { %v1082_v33 = vsel %vm75_vm0, %v1078_v11, 0.0  ;;  %v1077_v34 = vadd.f32 %v1069_v32, %v1771_v2  ;;  %v1121_v2 = vld [vmem:[%s1989_s4 + $0x18] sm:$0xff] }
 0x9a4   :  { %1083 = vadd.xlane.f32.xlu1 %v1082_v33  ;;  %1541 = vmatprep.subr.mxu1 %v1121_v2 }
 0x9a5   :  { %v1079_v35 = vsel %vm75_vm0, %v1077_v34, 0.0  ;;  %1542 = vmatpush3.msra.mxu1 %v1121_v2  ;;  %v1402_v2 = vld [vmem:[%s1991_s6 + $0x7] ss:$0 sm:$0xff] }
 0x9a6   :  { %1080 = vadd.xlane.f32.xlu0 %v1079_v35  ;;  %1543 = vmatprep.subr.mxu1 %v1120_v45 }
 0x9a7   :  { %1544 = vmatpush3.msra.mxu1 %v1120_v45 }
 0x9a8   :  { %1545 = vmatprep.subr.mxu1 %v1119_v46 }
 0x9a9   :  { %1546 = vmatpush3.msra.mxu1 %v1119_v46 }
 0x9aa   :  { %1547 = vmatprep.subr.mxu1 %v1118_v47 }
 0x9ab   :  { %1548 = vmatpush3.msra.mxu1 %v1118_v47 }
 0xa2d   :  { %v1084_v36 = vpop.xlane.xlu1 %1083 }
 0xa2e   :  { %v1087_v37 = vmul.f32 0.03125, %v1084_v36 }
 0xa2f   :  { %v1081_v38 = vpop.xlane.xlu0 %1080 }
 0xa30   :  { %v1086_v39 = vmul.f32 0.03125, %v1081_v38  ;;  %v1089_v40 = vsub.f32 %v1078_v11, %v1087_v37 }
 0xa32   :  { %v1088_v41 = vsub.f32 %v1077_v34, %v1086_v39  ;;  %v1091_v44 = vmul.f32 %v1089_v40, %v1089_v40 }
 0xa34   :  { %v1090_v42 = vmul.f32 %v1088_v41, %v1088_v41  ;;  %v1095_v5 = vsel %vm75_vm0, %v1091_v44, 0.0 }
 0xa36   :  { %v1092_v43 = vsel %vm75_vm0, %v1090_v42, 0.0 }
 0xa37   :  { %1093 = vadd.xlane.f32.xlu0 %v1092_v43  ;;  %v1401_v43 = vld [vmem:[%s1991_s6 + $0x6] ss:$0 sm:$0xff] }
 0xa3b   :  { %1096 = vadd.xlane.f32.xlu0 %v1095_v5 }
 0xac0   :  { %v1094_v52 = vpop.xlane.xlu0 %1093 }
 0xac1   :  { %v1098_v17 = vmul.f32 0.03125, %v1094_v52 }
 0xac3   :  { %v1100_v53 = vadd.f32 1e-05, %v1098_v17 }
 0xac4   :  { %v1097_v19 = vpop.xlane.xlu0 %1096 }
 0xac5   :  { %1621 = vrsqrt.f32 %v1100_v53  ;;  %v1099_v54 = vmul.f32 0.03125, %v1097_v19 }
 0xac7   :  { %v1101_v55 = vadd.f32 1e-05, %v1099_v54 }
 0xac9   :  { %1623 = vrsqrt.f32 %v1101_v55 }
 0xad2   :  { %v1622_v56 = vpop.eup %1621 }
 0xad3   :  { %v1104_v8 = vmul.f32 %v1622_v56, %v1088_v41 }
 0xad5   :  { %v1110_v59 = vmul.f32 %v1393_v57, %v1104_v8 }
 0xad6   :  { %v1624_v60 = vpop.eup %1623 }
 0xad7   :  { %v1105_v61 = vmul.f32 %v1624_v60, %v1089_v40  ;;  %v1116_v62 = vadd.f32 %v1394_v58, %v1110_v59 }
 0xad9   :  { %v1111_v63 = vmul.f32 %v1393_v57, %v1105_v61  ;;  %1549 = vmatprep.mubr.msk.f32.mxu1 %vm75_vm0, %v1116_v62 }
 0xadb   :  { %v1117_v0 = vadd.f32 %v1394_v58, %v1111_v63 }
 0xadd   :  { %1550 = vmatmul.mubr.msk.f32.vlgmr.msra.gmra.mxu1 %vm75_vm0, %v1117_v0 }
 0xb9d   :  { %v1551_v7 = vpop.f32.mrf.mxu1 }
 0xb9e   :  { %v1204_v9 = vadd.f32 %v1551_v7, %v1395_v6 }
 0xb9f   :  { %v1198_v13 = vpop.f32.mrf.mxu1 }
 0xba0   :  { %v1199_v14 = vadd.f32 %v1395_v6, %v1198_v13  ;;  %v1208_v16 = vmax.f32 %v1204_v9, 0.0 }
 0xba2   :  { %v1207_v15 = vmax.f32 %v1199_v14, 0.0 }
 0xba4   :  { %1568 = vmatprep.mubr.msk.f32.mxu0 %vm1221_vm4, %v1207_v15 }
 0xba5   :  { %1569 = vmatmul.mubr.msk.f32.vlgmr.msra.gmra.mxu0 %vm1221_vm4, %v1208_v16 }
 0xc65   :  { %v1570_v20 = vpop.f32.mrf.mxu0 }
 0xc66   :  { %v1300_v21 = vadd.f32 %v1570_v20, %v1398_v18 }
 0xc67   :  { %v1294_v22 = vpop.f32.mrf.mxu0 }
 0xc68   :  { %v1295_v23 = vadd.f32 %v1398_v18, %v1294_v22  ;;  %v1304_v24 = vadd.f32 %v1300_v21, %v1117_v0 }
 0xc6a   :  { %v1308_v25 = vsel %vm75_vm0, %v1304_v24, 0.0  ;;  %v1303_v26 = vadd.f32 %v1295_v23, %v1116_v62 }
 0xc6b   :  { %1309 = vadd.xlane.f32.xlu0 %v1308_v25 }
 0xc6c   :  { %v1305_v27 = vsel %vm75_vm0, %v1303_v26, 0.0 }
 0xc6d   :  { %1306 = vadd.xlane.f32.xlu1 %v1305_v27 }
 0xcf4   :  { %v1310_v28 = vpop.xlane.xlu0 %1309 }
 0xcf5   :  { %v1312_v12 = vmul.f32 0.03125, %v1310_v28 }
 0xcf6   :  { %v1307_v29 = vpop.xlane.xlu1 %1306 }
 0xcf7   :  { %v1314_v30 = vsub.f32 %v1304_v24, %v1312_v12  ;;  %v1311_v31 = vmul.f32 0.03125, %v1307_v29 }
 0xcf9   :  { %v1313_v32 = vsub.f32 %v1303_v26, %v1311_v31  ;;  %v1316_v11 = vmul.f32 %v1314_v30, %v1314_v30 }
 0xcfb   :  { %v1320_v33 = vsel %vm75_vm0, %v1316_v11, 0.0  ;;  %v1315_v34 = vmul.f32 %v1313_v32, %v1313_v32 }
 0xcfc   :  { %1321 = vadd.xlane.f32.xlu0 %v1320_v33 }
 0xcfd   :  { %v1317_v35 = vsel %vm75_vm0, %v1315_v34, 0.0 }
 0xcfe   :  { %1318 = vadd.xlane.f32.xlu1 %v1317_v35 }
 0xd85   :  { %v1322_v36 = vpop.xlane.xlu0 %1321 }
 0xd86   :  { %v1324_v37 = vmul.f32 0.03125, %v1322_v36 }
 0xd87   :  { %v1319_v38 = vpop.xlane.xlu1 %1318 }
 0xd88   :  { %v1326_v39 = vadd.f32 1e-05, %v1324_v37  ;;  %v1323_v40 = vmul.f32 0.03125, %v1319_v38 }
 0xd8a   :  { %1625 = vrsqrt.f32 %v1326_v39  ;;  %v1325_v41 = vadd.f32 1e-05, %v1323_v40 }
 0xd8c   :  { %1627 = vrsqrt.f32 %v1325_v41 }
 0xd97   :  { %v1626_v42 = vpop.eup %1625 }
 0xd98   :  { %v1330_v44 = vmul.f32 %v1626_v42, %v1314_v30 }
 0xd99   :  { %v1628_v5 = vpop.eup %1627 }
 0xd9a   :  { %v1329_v45 = vmul.f32 %v1628_v5, %v1313_v32  ;;  %v1336_v46 = vmul.f32 %v1401_v43, %v1330_v44 }
 0xd9c   :  { %v1335_v47 = vmul.f32 %v1401_v43, %v1329_v45  ;;  %v1342_v48 = vadd.f32 %v1402_v2, %v1336_v46 }
 0xd9e   :  { %v1341_v49 = vadd.f32 %v1402_v2, %v1335_v47  ;;  %1344 = vst.msk [vmem:[#allocation7 + $0x8] sm:$0xff] %vm75_vm0, %v1342_v48 }
 0xda0   :  { %1343 = vst.msk [vmem:[#allocation7] sm:$0xff] %vm75_vm0, %v1341_v49 }
 0xda1   :  { %1680 = shalt.err (!%p1677_p0)
}
 0xda2   :  { %1356 = dma.vmem_to_hbm [thread:$0]  %s1351_s30, 256, %s1992_s7, [#allocation4], %s1696_s27, %s1696_s27, %s1697_s28  }
 0xda3   :  { %1693 = dma.done.wait [#allocation4], 256  }
 0xda4   :  { %1694 = vsyncadd [#allocation4], 4294967040 }
 0xda5   :  { %1360 = vsyncpa [#allocation3], 1 }
 0xda6   :  { %1361 = vsyncpa [#allocation6], 1 }
 0xda7   :  { %1362 = vsyncpa [#allocation4], 1 }

</bundles_post_ra>
